<compile_context>
chip_gen: v7x
topology: tpu7x:2x2x1
jax: 0.10.0
libtpu: 0.0.40
codegen_flags: <defaults>
</compile_context>

<pallas_src>
import jax
import jax.numpy as jnp
from jax import lax
from jax.experimental import pallas as pl
from jax.experimental.pallas import tpu as pltpu

# Articulator name constants (as in the original vocal-tract codebase).
LOWER_LIP = "lower-lip"
PHARYNX = "pharynx"
SOFT_PALATE = "soft-palate"
TONGUE = "tongue"
UPPER_INCISOR = "upper-incisor"
UPPER_LIP = "upper-lip"

TV_TO_ARTICULATOR_MAP = {
    "LA": [LOWER_LIP, UPPER_LIP],
    "TTCD": [TONGUE, UPPER_INCISOR],
    "TBCD": [TONGUE, UPPER_INCISOR],
    "VEL": [SOFT_PALATE, PHARYNX],
}


# --------------------------------------------------------------------------
# Kernel
# --------------------------------------------------------------------------
def _min_cdist_kernel(coords_ref, out_ref):
    """coords_ref: (4, S, TILE_P) packed [Ax, Ay, Bx, By], pairs on lanes.

    Writes out_ref (1, TILE_P) = min_{i,j} ||A_i - B_j||_2 per pair-lane.
    Loop over A-samples with a running min; each step touches only an
    (S, TILE_P) slab, so nothing S^2-sized ever hits VMEM.
    """
    S = coords_ref.shape[1]
    bx = coords_ref[2]                          # (S, TILE_P), B-samples on sublanes
    by = coords_ref[3]

    def fold(i, run_min):
        # One A-sample row against all B-samples.
        ax_i = coords_ref[0, pl.ds(i, 1), :]    # (1, TILE_P)
        ay_i = coords_ref[1, pl.ds(i, 1), :]
        dx = ax_i - bx                          # broadcast over sublanes -> (S, TILE_P)
        dy = ay_i - by
        d2 = dx * dx + dy * dy
        # Sublane (B-sample) reduce on the XLU, then a 1-row VALU running min.
        return jnp.minimum(run_min, jnp.min(d2, axis=0, keepdims=True))

    init = jnp.full(out_ref.shape, jnp.inf, dtype=jnp.float32)
    unroll = True if S <= 32 else 8             # full unroll for small S (LLO visibility)
    run_min = lax.fori_loop(0, S, fold, init, unroll=unroll)
    out_ref[...] = jnp.sqrt(run_min)            # one sqrt per lane, after the min


# --------------------------------------------------------------------------
# Sizing / spec helpers
# --------------------------------------------------------------------------
def _vmem_capacity_bytes():
    try:
        return int(pltpu.get_tpu_info().vmem_capacity_bytes)
    except Exception:
        return 64 * 1024 * 1024                 # v7x per-core VMEM (smallest gen)


def _vmem_limit_bytes():
    return int(min(_vmem_capacity_bytes() // 2, 32 * 1024 * 1024))


def _pick_tile_p(P, S):
    """Largest lane tile (multiple of 128, <= 1024) whose per-tile VMEM need
    (3x-buffered (4,S,tile) input + a few live (S,tile) slabs) fits the budget,
    while keeping >= 2 grid steps when P allows (both v7x TensorCores busy)."""
    budget = _vmem_limit_bytes() // 2
    per_lane = (3 * 4 * S + 8 * S + 8) * 4      # bytes per lane of tile
    cap = max(128, (budget // per_lane) // 128 * 128)
    p_blocks = -(-P // 128)                     # number of 128-lane blocks needed
    tile = min(1024, cap, p_blocks * 128)
    if p_blocks >= 2:                           # ensure >= 2 grid steps when possible
        tile = min(tile, (-(-p_blocks // 2)) * 128)
    return int(max(128, tile))


def _make_in_spec(S, tile_p, n_tiles):
    idx = lambda i: (0, 0, i)
    if n_tiles >= 3 and hasattr(pl, "Buffered"):
        try:
            # 3-deep input pipelining hides the input DMA on v5e; harmless elsewhere.
            return pl.BlockSpec((4, S, tile_p), idx, pipeline_mode=pl.Buffered(3))
        except TypeError:
            pass
    return pl.BlockSpec((4, S, tile_p), idx)


def min_pairwise_distance(planes):
    """planes: (4, S, P) float32 packed [Ax, Ay, Bx, By] -> (P,) min distance."""
    four, S, P = planes.shape
    assert four == 4
    tile_p = _pick_tile_p(P, S)
    n_tiles = -(-P // tile_p)
    P_pad = n_tiles * tile_p
    if P_pad != P:
        planes = jnp.pad(planes, ((0, 0), (0, 0), (0, P_pad - P)))

    out = pl.pallas_call(
        _min_cdist_kernel,
        out_shape=jax.ShapeDtypeStruct((1, P_pad), jnp.float32),
        grid_spec=pltpu.PrefetchScalarGridSpec(
            num_scalar_prefetch=0,
            grid=(n_tiles,),
            in_specs=[_make_in_spec(S, tile_p, n_tiles)],
            out_specs=pl.BlockSpec((1, tile_p), lambda i: (0, i)),
        ),
        compiler_params=pltpu.CompilerParams(
            dimension_semantics=("parallel",),
            vmem_limit_bytes=_vmem_limit_bytes(),
        ),
    )(planes)
    return out[0, :P]                           # padded lanes (distance 0) sliced off


# --------------------------------------------------------------------------
# Module
# --------------------------------------------------------------------------
class CriticalLoss:
    """JAX/Pallas port of the PyTorch CriticalLoss module (no parameters)."""

    def __init__(self, TVs, articulators, denormalize_fn=None):
        self.TVs = sorted(TVs)
        self.inject_reference = UPPER_INCISOR not in articulators
        if UPPER_INCISOR not in articulators:
            articulators = sorted(articulators + [UPPER_INCISOR])
        self.articulators_indices = {a: i for i, a in enumerate(articulators)}
        # TODO(synk): denormalize_fn hooks are not implemented (denorm_fn=None path only).
        self.denorm_fn = denormalize_fn

    def __call__(self, output_shapes, target_shapes, reference_arrays, critical_mask):
        if len(self.TVs) == 0:
            return jnp.float32(0.0)
        if self.inject_reference:
            ref_index = self.articulators_indices[UPPER_INCISOR]
            output_shapes = jnp.concatenate(
                [output_shapes[:, :, :ref_index],
                 reference_arrays,
                 output_shapes[:, :, ref_index:]],
                axis=2,
            )
        bs, seq_len, _, _, num_samples = target_shapes.shape
        n_tv = len(self.TVs)
        P = bs * n_tv * seq_len

        # One gather of both articulators per TV, then ONE fused layout pass
        # straight into the kernel layout (4, S, P):
        #   plane order [Ax, Ay, Bx, By]; P ordered (bs, tv, seq); pairs on lanes.
        flat_idx = []
        for TV in self.TVs:
            a1, a2 = TV_TO_ARTICULATOR_MAP[TV]
            flat_idx += [self.articulators_indices[a1], self.articulators_indices[a2]]
        gathered = jnp.take(output_shapes.astype(jnp.float32),
                            jnp.array(flat_idx, dtype=jnp.int32), axis=2)
        gathered = gathered.reshape(bs, seq_len, n_tv, 2, 2, num_samples)
        planes = jnp.transpose(gathered, (3, 4, 5, 0, 2, 1)).reshape(
            4, num_samples, P)

        mins = min_pairwise_distance(planes).reshape(bs, n_tv, seq_len)

        # critical_loss[critical_mask == 1].mean() -> masked mean (glue).
        # NaN if the mask is empty, matching torch .mean() on an empty selection.
        sel = (critical_mask == 1).astype(jnp.float32)
        return jnp.sum(mins * sel) / jnp.sum(sel)


# --------------------------------------------------------------------------
# Pure-JAX reference (verification)
# --------------------------------------------------------------------------
def reference_loss(TVs, articulators, output_shapes, target_shapes,
                   reference_arrays, critical_mask):
    """Pure-JAX mirror of the original PyTorch forward (for verification)."""
    TVs = sorted(TVs)
    inject = UPPER_INCISOR not in articulators
    if inject:
        articulators = sorted(articulators + [UPPER_INCISOR])
    idx = {a: i for i, a in enumerate(articulators)}
    if inject:
        r = idx[UPPER_INCISOR]
        output_shapes = jnp.concatenate(
            [output_shapes[:, :, :r], reference_arrays, output_shapes[:, :, r:]],
            axis=2)
    bs, seq_len, _, _, S = target_shapes.shape
    dists = []
    for TV in TVs:
        a1, a2 = TV_TO_ARTICULATOR_MAP[TV]
        x1 = jnp.swapaxes(output_shapes[..., idx[a1], :, :], 2, 3)  # (bs,seq,S,2)
        x2 = jnp.swapaxes(output_shapes[..., idx[a2], :, :], 2, 3)
        diff = x1[:, :, :, None, :] - x2[:, :, None, :, :]
        dists.append(jnp.sqrt(jnp.sum(diff * diff, axis=-1)))       # (bs,seq,S,S)
    cl = jnp.stack(dists, axis=0).transpose(1, 0, 2, 3, 4)
    cl = cl.reshape(bs, len(TVs), seq_len, S * S).min(axis=-1)
    sel = (critical_mask == 1).astype(jnp.float32)
    return jnp.sum(cl * sel) / jnp.sum(sel)


if __name__ == "__main__":
    key = jax.random.PRNGKey(0)
    bs, seq_len, S = 2, 8, 16
    model_articulators = [LOWER_LIP, TONGUE, UPPER_LIP]  # no upper incisor -> inject_reference
    TVs = ["LA", "TTCD"]
    n_art = len(model_articulators)

    k1, k2, k3, k4 = jax.random.split(key, 4)
    output_shapes = jax.random.normal(k1, (bs, seq_len, n_art, 2, S), jnp.float32)
    reference_arrays = jax.random.normal(k2, (bs, seq_len, 1, 2, S), jnp.float32)
    target_shapes = jax.random.normal(k3, (bs, seq_len, n_art + 1, 2, S), jnp.float32)
    critical_mask = (jax.random.uniform(k4, (bs, len(TVs), seq_len)) > 0.5).astype(jnp.int32)
    critical_mask = critical_mask.at[0, 0, 0].set(1)  # ensure non-empty selection

    loss_fn = CriticalLoss(TVs, model_articulators, denormalize_fn=None)
    loss = jax.block_until_ready(
        loss_fn(output_shapes, target_shapes, reference_arrays, critical_mask))

    ref = jax.block_until_ready(
        reference_loss(TVs, model_articulators, output_shapes, target_shapes,
                       reference_arrays, critical_mask))

    assert abs(float(loss) - float(ref)) < 1e-4, (float(loss), float(ref))
    print("KERNEL_OK")
</pallas_src>

<mosaic_0001>
module attributes {stable_mosaic.version = 11 : i64} {
  func.func @_min_cdist_kernel(%arg0: i32, %arg1: memref<4x16x128xf32, #tpu.memory_space<vmem>>, %arg2: memref<1x128xf32, #tpu.memory_space<vmem>>) attributes {dimension_semantics = [#tpu.dimension_semantics<parallel>], iteration_bounds = array<i64: 1>, scalar_prefetch = 0 : i64, scratch_operands = 0 : i64, tpu.core_type = #tpu.core_type<tc>, window_params = [{transform_indices = @transform_0, window_bounds = array<i64: 4, 16, 128>}, {transform_indices = @transform_1, window_bounds = array<i64: 1, 128>}]} {
    %c2 = arith.constant 2 : index
    %c0 = arith.constant 0 : index
    %c0_0 = arith.constant 0 : index
    %0 = vector.load %arg1[%c2, %c0, %c0_0] : memref<4x16x128xf32, #tpu.memory_space<vmem>>, vector<1x16x128xf32>
    %1 = vector.shape_cast %0 : vector<1x16x128xf32> to vector<16x128xf32>
    %c3 = arith.constant 3 : index
    %c0_1 = arith.constant 0 : index
    %c0_2 = arith.constant 0 : index
    %2 = vector.load %arg1[%c3, %c0_1, %c0_2] : memref<4x16x128xf32, #tpu.memory_space<vmem>>, vector<1x16x128xf32>
    %3 = vector.shape_cast %2 : vector<1x16x128xf32> to vector<16x128xf32>
    %cst = arith.constant 0x7F800000 : f32
    %4 = vector.broadcast %cst : f32 to vector<1x128xf32>
    %c0_i32 = arith.constant 0 : i32
    %c0_3 = arith.constant 0 : index
    %5 = arith.index_cast %c0_i32 : i32 to index
    %c0_4 = arith.constant 0 : index
    %6 = vector.load %arg1[%c0_3, %5, %c0_4] : memref<4x16x128xf32, #tpu.memory_space<vmem>>, vector<1x1x128xf32>
    %7 = vector.shape_cast %6 : vector<1x1x128xf32> to vector<1x128xf32>
    %c1 = arith.constant 1 : index
    %8 = arith.index_cast %c0_i32 : i32 to index
    %c0_5 = arith.constant 0 : index
    %9 = vector.load %arg1[%c1, %8, %c0_5] : memref<4x16x128xf32, #tpu.memory_space<vmem>>, vector<1x1x128xf32>
    %10 = vector.shape_cast %9 : vector<1x1x128xf32> to vector<1x128xf32>
    %11 = vector.broadcast %7 : vector<1x128xf32> to vector<16x128xf32>
    %12 = arith.subf %11, %1 : vector<16x128xf32>
    %13 = vector.broadcast %10 : vector<1x128xf32> to vector<16x128xf32>
    %14 = arith.subf %13, %3 : vector<16x128xf32>
    %15 = arith.mulf %12, %12 : vector<16x128xf32>
    %16 = arith.mulf %14, %14 : vector<16x128xf32>
    %17 = arith.addf %15, %16 : vector<16x128xf32>
    %cst_6 = arith.constant dense<0x7F800000> : vector<128xf32>
    %18 = vector.multi_reduction <minimumf>, %17, %cst_6 [0] : vector<16x128xf32> to vector<128xf32>
    %19 = vector.shape_cast %18 : vector<128xf32> to vector<1x128xf32>
    %20 = arith.minimumf %4, %19 : vector<1x128xf32>
    %c1_i32 = arith.constant 1 : i32
    %c0_7 = arith.constant 0 : index
    %21 = arith.index_cast %c1_i32 : i32 to index
    %c0_8 = arith.constant 0 : index
    %22 = vector.load %arg1[%c0_7, %21, %c0_8] : memref<4x16x128xf32, #tpu.memory_space<vmem>>, vector<1x1x128xf32>
    %23 = vector.shape_cast %22 : vector<1x1x128xf32> to vector<1x128xf32>
    %c1_9 = arith.constant 1 : index
    %24 = arith.index_cast %c1_i32 : i32 to index
    %c0_10 = arith.constant 0 : index
    %25 = vector.load %arg1[%c1_9, %24, %c0_10] : memref<4x16x128xf32, #tpu.memory_space<vmem>>, vector<1x1x128xf32>
    %26 = vector.shape_cast %25 : vector<1x1x128xf32> to vector<1x128xf32>
    %27 = vector.broadcast %23 : vector<1x128xf32> to vector<16x128xf32>
    %28 = arith.subf %27, %1 : vector<16x128xf32>
    %29 = vector.broadcast %26 : vector<1x128xf32> to vector<16x128xf32>
    %30 = arith.subf %29, %3 : vector<16x128xf32>
    %31 = arith.mulf %28, %28 : vector<16x128xf32>
    %32 = arith.mulf %30, %30 : vector<16x128xf32>
    %33 = arith.addf %31, %32 : vector<16x128xf32>
    %cst_11 = arith.constant dense<0x7F800000> : vector<128xf32>
    %34 = vector.multi_reduction <minimumf>, %33, %cst_11 [0] : vector<16x128xf32> to vector<128xf32>
    %35 = vector.shape_cast %34 : vector<128xf32> to vector<1x128xf32>
    %36 = arith.minimumf %20, %35 : vector<1x128xf32>
    %c2_i32 = arith.constant 2 : i32
    %c0_12 = arith.constant 0 : index
    %37 = arith.index_cast %c2_i32 : i32 to index
    %c0_13 = arith.constant 0 : index
    %38 = vector.load %arg1[%c0_12, %37, %c0_13] : memref<4x16x128xf32, #tpu.memory_space<vmem>>, vector<1x1x128xf32>
    %39 = vector.shape_cast %38 : vector<1x1x128xf32> to vector<1x128xf32>
    %c1_14 = arith.constant 1 : index
    %40 = arith.index_cast %c2_i32 : i32 to index
    %c0_15 = arith.constant 0 : index
    %41 = vector.load %arg1[%c1_14, %40, %c0_15] : memref<4x16x128xf32, #tpu.memory_space<vmem>>, vector<1x1x128xf32>
    %42 = vector.shape_cast %41 : vector<1x1x128xf32> to vector<1x128xf32>
    %43 = vector.broadcast %39 : vector<1x128xf32> to vector<16x128xf32>
    %44 = arith.subf %43, %1 : vector<16x128xf32>
    %45 = vector.broadcast %42 : vector<1x128xf32> to vector<16x128xf32>
    %46 = arith.subf %45, %3 : vector<16x128xf32>
    %47 = arith.mulf %44, %44 : vector<16x128xf32>
    %48 = arith.mulf %46, %46 : vector<16x128xf32>
    %49 = arith.addf %47, %48 : vector<16x128xf32>
    %cst_16 = arith.constant dense<0x7F800000> : vector<128xf32>
    %50 = vector.multi_reduction <minimumf>, %49, %cst_16 [0] : vector<16x128xf32> to vector<128xf32>
    %51 = vector.shape_cast %50 : vector<128xf32> to vector<1x128xf32>
    %52 = arith.minimumf %36, %51 : vector<1x128xf32>
    %c3_i32 = arith.constant 3 : i32
    %c0_17 = arith.constant 0 : index
    %53 = arith.index_cast %c3_i32 : i32 to index
    %c0_18 = arith.constant 0 : index
    %54 = vector.load %arg1[%c0_17, %53, %c0_18] : memref<4x16x128xf32, #tpu.memory_space<vmem>>, vector<1x1x128xf32>
    %55 = vector.shape_cast %54 : vector<1x1x128xf32> to vector<1x128xf32>
    %c1_19 = arith.constant 1 : index
    %56 = arith.index_cast %c3_i32 : i32 to index
    %c0_20 = arith.constant 0 : index
    %57 = vector.load %arg1[%c1_19, %56, %c0_20] : memref<4x16x128xf32, #tpu.memory_space<vmem>>, vector<1x1x128xf32>
    %58 = vector.shape_cast %57 : vector<1x1x128xf32> to vector<1x128xf32>
    %59 = vector.broadcast %55 : vector<1x128xf32> to vector<16x128xf32>
    %60 = arith.subf %59, %1 : vector<16x128xf32>
    %61 = vector.broadcast %58 : vector<1x128xf32> to vector<16x128xf32>
    %62 = arith.subf %61, %3 : vector<16x128xf32>
    %63 = arith.mulf %60, %60 : vector<16x128xf32>
    %64 = arith.mulf %62, %62 : vector<16x128xf32>
    %65 = arith.addf %63, %64 : vector<16x128xf32>
    %cst_21 = arith.constant dense<0x7F800000> : vector<128xf32>
    %66 = vector.multi_reduction <minimumf>, %65, %cst_21 [0] : vector<16x128xf32> to vector<128xf32>
    %67 = vector.shape_cast %66 : vector<128xf32> to vector<1x128xf32>
    %68 = arith.minimumf %52, %67 : vector<1x128xf32>
    %c4_i32 = arith.constant 4 : i32
    %c0_22 = arith.constant 0 : index
    %69 = arith.index_cast %c4_i32 : i32 to index
    %c0_23 = arith.constant 0 : index
    %70 = vector.load %arg1[%c0_22, %69, %c0_23] : memref<4x16x128xf32, #tpu.memory_space<vmem>>, vector<1x1x128xf32>
    %71 = vector.shape_cast %70 : vector<1x1x128xf32> to vector<1x128xf32>
    %c1_24 = arith.constant 1 : index
    %72 = arith.index_cast %c4_i32 : i32 to index
    %c0_25 = arith.constant 0 : index
    %73 = vector.load %arg1[%c1_24, %72, %c0_25] : memref<4x16x128xf32, #tpu.memory_space<vmem>>, vector<1x1x128xf32>
    %74 = vector.shape_cast %73 : vector<1x1x128xf32> to vector<1x128xf32>
    %75 = vector.broadcast %71 : vector<1x128xf32> to vector<16x128xf32>
    %76 = arith.subf %75, %1 : vector<16x128xf32>
    %77 = vector.broadcast %74 : vector<1x128xf32> to vector<16x128xf32>
    %78 = arith.subf %77, %3 : vector<16x128xf32>
    %79 = arith.mulf %76, %76 : vector<16x128xf32>
    %80 = arith.mulf %78, %78 : vector<16x128xf32>
    %81 = arith.addf %79, %80 : vector<16x128xf32>
    %cst_26 = arith.constant dense<0x7F800000> : vector<128xf32>
    %82 = vector.multi_reduction <minimumf>, %81, %cst_26 [0] : vector<16x128xf32> to vector<128xf32>
    %83 = vector.shape_cast %82 : vector<128xf32> to vector<1x128xf32>
    %84 = arith.minimumf %68, %83 : vector<1x128xf32>
    %c5_i32 = arith.constant 5 : i32
    %c0_27 = arith.constant 0 : index
    %85 = arith.index_cast %c5_i32 : i32 to index
    %c0_28 = arith.constant 0 : index
    %86 = vector.load %arg1[%c0_27, %85, %c0_28] : memref<4x16x128xf32, #tpu.memory_space<vmem>>, vector<1x1x128xf32>
    %87 = vector.shape_cast %86 : vector<1x1x128xf32> to vector<1x128xf32>
    %c1_29 = arith.constant 1 : index
    %88 = arith.index_cast %c5_i32 : i32 to index
    %c0_30 = arith.constant 0 : index
    %89 = vector.load %arg1[%c1_29, %88, %c0_30] : memref<4x16x128xf32, #tpu.memory_space<vmem>>, vector<1x1x128xf32>
    %90 = vector.shape_cast %89 : vector<1x1x128xf32> to vector<1x128xf32>
    %91 = vector.broadcast %87 : vector<1x128xf32> to vector<16x128xf32>
    %92 = arith.subf %91, %1 : vector<16x128xf32>
    %93 = vector.broadcast %90 : vector<1x128xf32> to vector<16x128xf32>
    %94 = arith.subf %93, %3 : vector<16x128xf32>
    %95 = arith.mulf %92, %92 : vector<16x128xf32>
    %96 = arith.mulf %94, %94 : vector<16x128xf32>
    %97 = arith.addf %95, %96 : vector<16x128xf32>
    %cst_31 = arith.constant dense<0x7F800000> : vector<128xf32>
    %98 = vector.multi_reduction <minimumf>, %97, %cst_31 [0] : vector<16x128xf32> to vector<128xf32>
    %99 = vector.shape_cast %98 : vector<128xf32> to vector<1x128xf32>
    %100 = arith.minimumf %84, %99 : vector<1x128xf32>
    %c6_i32 = arith.constant 6 : i32
    %c0_32 = arith.constant 0 : index
    %101 = arith.index_cast %c6_i32 : i32 to index
    %c0_33 = arith.constant 0 : index
    %102 = vector.load %arg1[%c0_32, %101, %c0_33] : memref<4x16x128xf32, #tpu.memory_space<vmem>>, vector<1x1x128xf32>
    %103 = vector.shape_cast %102 : vector<1x1x128xf32> to vector<1x128xf32>
    %c1_34 = arith.constant 1 : index
    %104 = arith.index_cast %c6_i32 : i32 to index
    %c0_35 = arith.constant 0 : index
    %105 = vector.load %arg1[%c1_34, %104, %c0_35] : memref<4x16x128xf32, #tpu.memory_space<vmem>>, vector<1x1x128xf32>
    %106 = vector.shape_cast %105 : vector<1x1x128xf32> to vector<1x128xf32>
    %107 = vector.broadcast %103 : vector<1x128xf32> to vector<16x128xf32>
    %108 = arith.subf %107, %1 : vector<16x128xf32>
    %109 = vector.broadcast %106 : vector<1x128xf32> to vector<16x128xf32>
    %110 = arith.subf %109, %3 : vector<16x128xf32>
    %111 = arith.mulf %108, %108 : vector<16x128xf32>
    %112 = arith.mulf %110, %110 : vector<16x128xf32>
    %113 = arith.addf %111, %112 : vector<16x128xf32>
    %cst_36 = arith.constant dense<0x7F800000> : vector<128xf32>
    %114 = vector.multi_reduction <minimumf>, %113, %cst_36 [0] : vector<16x128xf32> to vector<128xf32>
    %115 = vector.shape_cast %114 : vector<128xf32> to vector<1x128xf32>
    %116 = arith.minimumf %100, %115 : vector<1x128xf32>
    %c7_i32 = arith.constant 7 : i32
    %c0_37 = arith.constant 0 : index
    %117 = arith.index_cast %c7_i32 : i32 to index
    %c0_38 = arith.constant 0 : index
    %118 = vector.load %arg1[%c0_37, %117, %c0_38] : memref<4x16x128xf32, #tpu.memory_space<vmem>>, vector<1x1x128xf32>
    %119 = vector.shape_cast %118 : vector<1x1x128xf32> to vector<1x128xf32>
    %c1_39 = arith.constant 1 : index
    %120 = arith.index_cast %c7_i32 : i32 to index
    %c0_40 = arith.constant 0 : index
    %121 = vector.load %arg1[%c1_39, %120, %c0_40] : memref<4x16x128xf32, #tpu.memory_space<vmem>>, vector<1x1x128xf32>
    %122 = vector.shape_cast %121 : vector<1x1x128xf32> to vector<1x128xf32>
    %123 = vector.broadcast %119 : vector<1x128xf32> to vector<16x128xf32>
    %124 = arith.subf %123, %1 : vector<16x128xf32>
    %125 = vector.broadcast %122 : vector<1x128xf32> to vector<16x128xf32>
    %126 = arith.subf %125, %3 : vector<16x128xf32>
    %127 = arith.mulf %124, %124 : vector<16x128xf32>
    %128 = arith.mulf %126, %126 : vector<16x128xf32>
    %129 = arith.addf %127, %128 : vector<16x128xf32>
    %cst_41 = arith.constant dense<0x7F800000> : vector<128xf32>
    %130 = vector.multi_reduction <minimumf>, %129, %cst_41 [0] : vector<16x128xf32> to vector<128xf32>
    %131 = vector.shape_cast %130 : vector<128xf32> to vector<1x128xf32>
    %132 = arith.minimumf %116, %131 : vector<1x128xf32>
    %c8_i32 = arith.constant 8 : i32
    %c0_42 = arith.constant 0 : index
    %133 = arith.index_cast %c8_i32 : i32 to index
    %c0_43 = arith.constant 0 : index
    %134 = vector.load %arg1[%c0_42, %133, %c0_43] : memref<4x16x128xf32, #tpu.memory_space<vmem>>, vector<1x1x128xf32>
    %135 = vector.shape_cast %134 : vector<1x1x128xf32> to vector<1x128xf32>
    %c1_44 = arith.constant 1 : index
    %136 = arith.index_cast %c8_i32 : i32 to index
    %c0_45 = arith.constant 0 : index
    %137 = vector.load %arg1[%c1_44, %136, %c0_45] : memref<4x16x128xf32, #tpu.memory_space<vmem>>, vector<1x1x128xf32>
    %138 = vector.shape_cast %137 : vector<1x1x128xf32> to vector<1x128xf32>
    %139 = vector.broadcast %135 : vector<1x128xf32> to vector<16x128xf32>
    %140 = arith.subf %139, %1 : vector<16x128xf32>
    %141 = vector.broadcast %138 : vector<1x128xf32> to vector<16x128xf32>
    %142 = arith.subf %141, %3 : vector<16x128xf32>
    %143 = arith.mulf %140, %140 : vector<16x128xf32>
    %144 = arith.mulf %142, %142 : vector<16x128xf32>
    %145 = arith.addf %143, %144 : vector<16x128xf32>
    %cst_46 = arith.constant dense<0x7F800000> : vector<128xf32>
    %146 = vector.multi_reduction <minimumf>, %145, %cst_46 [0] : vector<16x128xf32> to vector<128xf32>
    %147 = vector.shape_cast %146 : vector<128xf32> to vector<1x128xf32>
    %148 = arith.minimumf %132, %147 : vector<1x128xf32>
    %c9_i32 = arith.constant 9 : i32
    %c0_47 = arith.constant 0 : index
    %149 = arith.index_cast %c9_i32 : i32 to index
    %c0_48 = arith.constant 0 : index
    %150 = vector.load %arg1[%c0_47, %149, %c0_48] : memref<4x16x128xf32, #tpu.memory_space<vmem>>, vector<1x1x128xf32>
    %151 = vector.shape_cast %150 : vector<1x1x128xf32> to vector<1x128xf32>
    %c1_49 = arith.constant 1 : index
    %152 = arith.index_cast %c9_i32 : i32 to index
    %c0_50 = arith.constant 0 : index
    %153 = vector.load %arg1[%c1_49, %152, %c0_50] : memref<4x16x128xf32, #tpu.memory_space<vmem>>, vector<1x1x128xf32>
    %154 = vector.shape_cast %153 : vector<1x1x128xf32> to vector<1x128xf32>
    %155 = vector.broadcast %151 : vector<1x128xf32> to vector<16x128xf32>
    %156 = arith.subf %155, %1 : vector<16x128xf32>
    %157 = vector.broadcast %154 : vector<1x128xf32> to vector<16x128xf32>
    %158 = arith.subf %157, %3 : vector<16x128xf32>
    %159 = arith.mulf %156, %156 : vector<16x128xf32>
    %160 = arith.mulf %158, %158 : vector<16x128xf32>
    %161 = arith.addf %159, %160 : vector<16x128xf32>
    %cst_51 = arith.constant dense<0x7F800000> : vector<128xf32>
    %162 = vector.multi_reduction <minimumf>, %161, %cst_51 [0] : vector<16x128xf32> to vector<128xf32>
    %163 = vector.shape_cast %162 : vector<128xf32> to vector<1x128xf32>
    %164 = arith.minimumf %148, %163 : vector<1x128xf32>
    %c10_i32 = arith.constant 10 : i32
    %c0_52 = arith.constant 0 : index
    %165 = arith.index_cast %c10_i32 : i32 to index
    %c0_53 = arith.constant 0 : index
    %166 = vector.load %arg1[%c0_52, %165, %c0_53] : memref<4x16x128xf32, #tpu.memory_space<vmem>>, vector<1x1x128xf32>
    %167 = vector.shape_cast %166 : vector<1x1x128xf32> to vector<1x128xf32>
    %c1_54 = arith.constant 1 : index
    %168 = arith.index_cast %c10_i32 : i32 to index
    %c0_55 = arith.constant 0 : index
    %169 = vector.load %arg1[%c1_54, %168, %c0_55] : memref<4x16x128xf32, #tpu.memory_space<vmem>>, vector<1x1x128xf32>
    %170 = vector.shape_cast %169 : vector<1x1x128xf32> to vector<1x128xf32>
    %171 = vector.broadcast %167 : vector<1x128xf32> to vector<16x128xf32>
    %172 = arith.subf %171, %1 : vector<16x128xf32>
    %173 = vector.broadcast %170 : vector<1x128xf32> to vector<16x128xf32>
    %174 = arith.subf %173, %3 : vector<16x128xf32>
    %175 = arith.mulf %172, %172 : vector<16x128xf32>
    %176 = arith.mulf %174, %174 : vector<16x128xf32>
    %177 = arith.addf %175, %176 : vector<16x128xf32>
    %cst_56 = arith.constant dense<0x7F800000> : vector<128xf32>
    %178 = vector.multi_reduction <minimumf>, %177, %cst_56 [0] : vector<16x128xf32> to vector<128xf32>
    %179 = vector.shape_cast %178 : vector<128xf32> to vector<1x128xf32>
    %180 = arith.minimumf %164, %179 : vector<1x128xf32>
    %c11_i32 = arith.constant 11 : i32
    %c0_57 = arith.constant 0 : index
    %181 = arith.index_cast %c11_i32 : i32 to index
    %c0_58 = arith.constant 0 : index
    %182 = vector.load %arg1[%c0_57, %181, %c0_58] : memref<4x16x128xf32, #tpu.memory_space<vmem>>, vector<1x1x128xf32>
    %183 = vector.shape_cast %182 : vector<1x1x128xf32> to vector<1x128xf32>
    %c1_59 = arith.constant 1 : index
    %184 = arith.index_cast %c11_i32 : i32 to index
    %c0_60 = arith.constant 0 : index
    %185 = vector.load %arg1[%c1_59, %184, %c0_60] : memref<4x16x128xf32, #tpu.memory_space<vmem>>, vector<1x1x128xf32>
    %186 = vector.shape_cast %185 : vector<1x1x128xf32> to vector<1x128xf32>
    %187 = vector.broadcast %183 : vector<1x128xf32> to vector<16x128xf32>
    %188 = arith.subf %187, %1 : vector<16x128xf32>
    %189 = vector.broadcast %186 : vector<1x128xf32> to vector<16x128xf32>
    %190 = arith.subf %189, %3 : vector<16x128xf32>
    %191 = arith.mulf %188, %188 : vector<16x128xf32>
    %192 = arith.mulf %190, %190 : vector<16x128xf32>
    %193 = arith.addf %191, %192 : vector<16x128xf32>
    %cst_61 = arith.constant dense<0x7F800000> : vector<128xf32>
    %194 = vector.multi_reduction <minimumf>, %193, %cst_61 [0] : vector<16x128xf32> to vector<128xf32>
    %195 = vector.shape_cast %194 : vector<128xf32> to vector<1x128xf32>
    %196 = arith.minimumf %180, %195 : vector<1x128xf32>
    %c12_i32 = arith.constant 12 : i32
    %c0_62 = arith.constant 0 : index
    %197 = arith.index_cast %c12_i32 : i32 to index
    %c0_63 = arith.constant 0 : index
    %198 = vector.load %arg1[%c0_62, %197, %c0_63] : memref<4x16x128xf32, #tpu.memory_space<vmem>>, vector<1x1x128xf32>
    %199 = vector.shape_cast %198 : vector<1x1x128xf32> to vector<1x128xf32>
    %c1_64 = arith.constant 1 : index
    %200 = arith.index_cast %c12_i32 : i32 to index
    %c0_65 = arith.constant 0 : index
    %201 = vector.load %arg1[%c1_64, %200, %c0_65] : memref<4x16x128xf32, #tpu.memory_space<vmem>>, vector<1x1x128xf32>
    %202 = vector.shape_cast %201 : vector<1x1x128xf32> to vector<1x128xf32>
    %203 = vector.broadcast %199 : vector<1x128xf32> to vector<16x128xf32>
    %204 = arith.subf %203, %1 : vector<16x128xf32>
    %205 = vector.broadcast %202 : vector<1x128xf32> to vector<16x128xf32>
    %206 = arith.subf %205, %3 : vector<16x128xf32>
    %207 = arith.mulf %204, %204 : vector<16x128xf32>
    %208 = arith.mulf %206, %206 : vector<16x128xf32>
    %209 = arith.addf %207, %208 : vector<16x128xf32>
    %cst_66 = arith.constant dense<0x7F800000> : vector<128xf32>
    %210 = vector.multi_reduction <minimumf>, %209, %cst_66 [0] : vector<16x128xf32> to vector<128xf32>
    %211 = vector.shape_cast %210 : vector<128xf32> to vector<1x128xf32>
    %212 = arith.minimumf %196, %211 : vector<1x128xf32>
    %c13_i32 = arith.constant 13 : i32
    %c0_67 = arith.constant 0 : index
    %213 = arith.index_cast %c13_i32 : i32 to index
    %c0_68 = arith.constant 0 : index
    %214 = vector.load %arg1[%c0_67, %213, %c0_68] : memref<4x16x128xf32, #tpu.memory_space<vmem>>, vector<1x1x128xf32>
    %215 = vector.shape_cast %214 : vector<1x1x128xf32> to vector<1x128xf32>
    %c1_69 = arith.constant 1 : index
    %216 = arith.index_cast %c13_i32 : i32 to index
    %c0_70 = arith.constant 0 : index
    %217 = vector.load %arg1[%c1_69, %216, %c0_70] : memref<4x16x128xf32, #tpu.memory_space<vmem>>, vector<1x1x128xf32>
    %218 = vector.shape_cast %217 : vector<1x1x128xf32> to vector<1x128xf32>
    %219 = vector.broadcast %215 : vector<1x128xf32> to vector<16x128xf32>
    %220 = arith.subf %219, %1 : vector<16x128xf32>
    %221 = vector.broadcast %218 : vector<1x128xf32> to vector<16x128xf32>
    %222 = arith.subf %221, %3 : vector<16x128xf32>
    %223 = arith.mulf %220, %220 : vector<16x128xf32>
    %224 = arith.mulf %222, %222 : vector<16x128xf32>
    %225 = arith.addf %223, %224 : vector<16x128xf32>
    %cst_71 = arith.constant dense<0x7F800000> : vector<128xf32>
    %226 = vector.multi_reduction <minimumf>, %225, %cst_71 [0] : vector<16x128xf32> to vector<128xf32>
    %227 = vector.shape_cast %226 : vector<128xf32> to vector<1x128xf32>
    %228 = arith.minimumf %212, %227 : vector<1x128xf32>
    %c14_i32 = arith.constant 14 : i32
    %c0_72 = arith.constant 0 : index
    %229 = arith.index_cast %c14_i32 : i32 to index
    %c0_73 = arith.constant 0 : index
    %230 = vector.load %arg1[%c0_72, %229, %c0_73] : memref<4x16x128xf32, #tpu.memory_space<vmem>>, vector<1x1x128xf32>
    %231 = vector.shape_cast %230 : vector<1x1x128xf32> to vector<1x128xf32>
    %c1_74 = arith.constant 1 : index
    %232 = arith.index_cast %c14_i32 : i32 to index
    %c0_75 = arith.constant 0 : index
    %233 = vector.load %arg1[%c1_74, %232, %c0_75] : memref<4x16x128xf32, #tpu.memory_space<vmem>>, vector<1x1x128xf32>
    %234 = vector.shape_cast %233 : vector<1x1x128xf32> to vector<1x128xf32>
    %235 = vector.broadcast %231 : vector<1x128xf32> to vector<16x128xf32>
    %236 = arith.subf %235, %1 : vector<16x128xf32>
    %237 = vector.broadcast %234 : vector<1x128xf32> to vector<16x128xf32>
    %238 = arith.subf %237, %3 : vector<16x128xf32>
    %239 = arith.mulf %236, %236 : vector<16x128xf32>
    %240 = arith.mulf %238, %238 : vector<16x128xf32>
    %241 = arith.addf %239, %240 : vector<16x128xf32>
    %cst_76 = arith.constant dense<0x7F800000> : vector<128xf32>
    %242 = vector.multi_reduction <minimumf>, %241, %cst_76 [0] : vector<16x128xf32> to vector<128xf32>
    %243 = vector.shape_cast %242 : vector<128xf32> to vector<1x128xf32>
    %244 = arith.minimumf %228, %243 : vector<1x128xf32>
    %c15_i32 = arith.constant 15 : i32
    %c0_77 = arith.constant 0 : index
    %245 = arith.index_cast %c15_i32 : i32 to index
    %c0_78 = arith.constant 0 : index
    %246 = vector.load %arg1[%c0_77, %245, %c0_78] : memref<4x16x128xf32, #tpu.memory_space<vmem>>, vector<1x1x128xf32>
    %247 = vector.shape_cast %246 : vector<1x1x128xf32> to vector<1x128xf32>
    %c1_79 = arith.constant 1 : index
    %248 = arith.index_cast %c15_i32 : i32 to index
    %c0_80 = arith.constant 0 : index
    %249 = vector.load %arg1[%c1_79, %248, %c0_80] : memref<4x16x128xf32, #tpu.memory_space<vmem>>, vector<1x1x128xf32>
    %250 = vector.shape_cast %249 : vector<1x1x128xf32> to vector<1x128xf32>
    %251 = vector.broadcast %247 : vector<1x128xf32> to vector<16x128xf32>
    %252 = arith.subf %251, %1 : vector<16x128xf32>
    %253 = vector.broadcast %250 : vector<1x128xf32> to vector<16x128xf32>
    %254 = arith.subf %253, %3 : vector<16x128xf32>
    %255 = arith.mulf %252, %252 : vector<16x128xf32>
    %256 = arith.mulf %254, %254 : vector<16x128xf32>
    %257 = arith.addf %255, %256 : vector<16x128xf32>
    %cst_81 = arith.constant dense<0x7F800000> : vector<128xf32>
    %258 = vector.multi_reduction <minimumf>, %257, %cst_81 [0] : vector<16x128xf32> to vector<128xf32>
    %259 = vector.shape_cast %258 : vector<128xf32> to vector<1x128xf32>
    %260 = arith.minimumf %244, %259 : vector<1x128xf32>
    %c16_i32 = arith.constant 16 : i32
    %261 = math.sqrt %260 : vector<1x128xf32>
    %c0_82 = arith.constant 0 : index
    %c0_83 = arith.constant 0 : index
    %262 = vector.load %arg2[%c0_82, %c0_83] : memref<1x128xf32, #tpu.memory_space<vmem>>, vector<1x128xf32>
    tpu.vector_store %arg2[%c0_82, %c0_83], %261 {strides = array<i32>} : memref<1x128xf32, #tpu.memory_space<vmem>>, vector<1x128xf32>,
    return
  }
  func.func @transform_0(%arg0: i32) -> (i32, i32, i32) {
    %c0_i32 = arith.constant 0 : i32
    %c0_i32_0 = arith.constant 0 : i32
    %c0_i32_1 = arith.constant 0 : i32
    return %c0_i32, %c0_i32_0, %arg0 : i32, i32, i32
  }
  func.func @transform_1(%arg0: i32) -> (i32, i32) {
    %c0_i32 = arith.constant 0 : i32
    %c0_i32_0 = arith.constant 0 : i32
    return %c0_i32, %arg0 : i32, i32
  }
}

</mosaic_0001>

<bundles_post_ra>
// kernel: tpu_custom_call.1
= control target key start
LH: loop header
LB: loop body
LE: loop exit
PB: predicated region body
PF: predicated region fallthrough
CT: control target
= control target key end

     0   :  { %6 = vsyncpa [#allocation3], 0  ;;  %s696_s0 = inlined_call_operand.hbm [shape: f32[4,16,128], index: 0, kind: input, shape index: {}]   ;;  %s697_s1 = inlined_call_operand.hbm [shape: f32[1,128], index: 1, kind: output, shape index: {}]  }
   0x1   :  { %7 = vsyncpa [#allocation4], 0  ;;  %s586_s6 = smov [#allocation2]   ;;  %s538_s10 = scalar_lea.hbm %s696_s0, 1024 }
   0x2   :  { %s13_s7 = sshll.u32 %s586_s6, 4  ;;  %p539_p0 = scmp.ne.s32.totalorder %s696_s0, %s538_s10  ;;  %s14_s7 = int_to_ptr.vmem [resolvable:$true] %s13_s7 }
   0x3   :  { %p542_p1 = scmp.lt.u32.totalorder %s538_s10, %s696_s0 }
   0x5   :  { %p544_p2 = pnand %p542_p1, %p539_p0 }
   0x7   :  { %547 = shalt.err (!%p544_p2)
}
   0x8   :  { %s548_s15 = scalar_lea.vmem %s14_s7, 1024  ;;  %p553_p4 = scmp.lt.s32.totalorder %s14_s7, %s14_s7 }
   0x9   :  { %p549_p3 = scmp.ne.s32.totalorder %s14_s7, %s548_s15  ;;  %p554_p5 = scmp.lt.s32.totalorder %s548_s15, %s548_s15 }
   0xb   :  { %p555_p6 = por %p554_p5, %p553_p4 }
   0xd   :  { %p556_p7 = pnand %p555_p6, %p549_p3 }
   0xf   :  { %559 = shalt.err (!%p556_p7)
}
  0x10   :  { %s587_s16 = smov 128   ;;  %s588_s17 = smov 8  }
  0x11   :  { %19 = dma.hbm_to_vmem [thread:$0]  %s696_s0, 1024, %s14_s7, [#allocation3], %s587_s16, %s587_s16, %s588_s17  }
  0x12   :  { %582 = dma.done.wait [#allocation3], 1024  }
  0x13   :  { %583 = vsyncadd [#allocation3], 4294966272  ;;  %v612_v0 = vld [vmem:[#allocation2 + $0x20] sm:$0xff]  ;;  %v614_v1 = vld [vmem:[#allocation2 + $0x28] sm:$0xff]  ;;  %s589_s0 = smov [#allocation5]  }
  0x14   :  { %v616_v2 = vld [vmem:[#allocation2 + $0x30] sm:$0xff]  ;;  %v618_v3 = vld [vmem:[#allocation2 + $0x38] sm:$0xff]  ;;  %v500_v4 = vld [vmem:[#allocation2] ss:$0 sm:$0xff]  ;;  %s491_s20 = sshll.u32 %s589_s0, 4  ;;  %s492_s20 = int_to_ptr.vmem [resolvable:$true] %s491_s20 }
  0x15   :  { %v501_v5 = vld [vmem:[#allocation2 + $0x10] ss:$0 sm:$0xff]  ;;  %v36_v6 = vsub.f32 %v500_v4, %v612_v0  ;;  %v37_v7 = vsub.f32 %v500_v4, %v614_v1  ;;  %v502_v10 = vld [vmem:[#allocation2 + $0x1] ss:$0 sm:$0xff]  ;;  %v503_v11 = vld [vmem:[#allocation2 + $0x11] ss:$0 sm:$0xff]  ;;  %p565_p9 = scmp.lt.s32.totalorder %s492_s20, %s492_s20 }
  0x16   :  { %v42_v8 = vsub.f32 %v501_v5, %v616_v2  ;;  %v43_v9 = vsub.f32 %v501_v5, %v618_v3  ;;  %v63_v12 = vsub.f32 %v502_v10, %v612_v0  ;;  %v64_v13 = vsub.f32 %v502_v10, %v614_v1  ;;  %v504_v16 = vld [vmem:[#allocation2 + $0x2] ss:$0 sm:$0xff]  ;;  %v505_v21 = vld [vmem:[#allocation2 + $0x12] ss:$0 sm:$0xff]  ;;  %v506_v26 = vld [vmem:[#allocation2 + $0x3] ss:$0 sm:$0xff] }
  0x17   :  { %v69_v14 = vsub.f32 %v503_v11, %v616_v2  ;;  %v70_v15 = vsub.f32 %v503_v11, %v618_v3  ;;  %v44_v17 = vmul.f32 %v36_v6, %v36_v6  ;;  %v45_v18 = vmul.f32 %v37_v7, %v37_v7  ;;  %v507_v35 = vld [vmem:[#allocation2 + $0x13] ss:$0 sm:$0xff]  ;;  %v508_v44 = vld [vmem:[#allocation2 + $0x4] ss:$0 sm:$0xff]  ;;  %v509_v49 = vld [vmem:[#allocation2 + $0x14] ss:$0 sm:$0xff] }
  0x18   :  { %v46_v19 = vmul.f32 %v42_v8, %v42_v8  ;;  %v47_v20 = vmul.f32 %v43_v9, %v43_v9  ;;  %v71_v22 = vmul.f32 %v63_v12, %v63_v12  ;;  %v72_v23 = vmul.f32 %v64_v13, %v64_v13  ;;  %v510_v6 = vld [vmem:[#allocation2 + $0x5] ss:$0 sm:$0xff]  ;;  %s560_s21 = scalar_lea.vmem %s492_s20, 16  ;;  %s564_s22 = scalar_lea.vmem %s492_s20, 32 }
  0x19   :  { %v73_v24 = vmul.f32 %v69_v14, %v69_v14  ;;  %v74_v25 = vmul.f32 %v70_v15, %v70_v15  ;;  %v91_v29 = vsub.f32 %v504_v16, %v612_v0  ;;  %v92_v30 = vsub.f32 %v504_v16, %v614_v1  ;;  %v511_v15 = vld [vmem:[#allocation2 + $0x15] ss:$0 sm:$0xff]  ;;  %p561_p8 = scmp.ne.s32.totalorder %s492_s20, %s560_s21  ;;  %p566_p10 = scmp.lt.s32.totalorder %s564_s22, %s560_s21 }
  0x1a   :  { %v48_v27 = vadd.f32 %v46_v19, %v44_v17  ;;  %v49_v28 = vadd.f32 %v47_v20, %v45_v18  ;;  %v97_v33 = vsub.f32 %v505_v21, %v616_v2  ;;  %v98_v34 = vsub.f32 %v505_v21, %v618_v3 }
  0x1b   :  { %v75_v31 = vadd.f32 %v73_v24, %v71_v22  ;;  %v76_v32 = vadd.f32 %v74_v25, %v72_v23  ;;  %v99_v37 = vmul.f32 %v91_v29, %v91_v29  ;;  %v100_v38 = vmul.f32 %v92_v30, %v92_v30  ;;  %p567_p11 = por %p566_p10, %p565_p9 }
  0x1c   :  { %v50_v36 = vmin.f32 %v48_v27, %v49_v28  ;;  %v119_v39 = vsub.f32 %v506_v26, %v612_v0  ;;  %v101_v41 = vmul.f32 %v97_v33, %v97_v33  ;;  %v102_v42 = vmul.f32 %v98_v34, %v98_v34  ;;  %v512_v28 = vld [vmem:[#allocation2 + $0x6] ss:$0 sm:$0xff] }
  0x1d   :  { %v77_v40 = vmin.f32 %v75_v31, %v76_v32  ;;  %v120_v43 = vsub.f32 %v506_v26, %v614_v1  ;;  %v125_v46 = vsub.f32 %v507_v35, %v616_v2  ;;  %v126_v47 = vsub.f32 %v507_v35, %v618_v3  ;;  %p568_p12 = pnand %p567_p11, %p561_p8 }
  0x1e   :  { %v51_v45 = vrot.slane %v50_v36, 4  ;;  %v127_v48 = vmul.f32 %v119_v39, %v119_v39  ;;  %v103_v51 = vadd.f32 %v101_v41, %v99_v37  ;;  %v104_v52 = vadd.f32 %v102_v42, %v100_v38  ;;  %v513_v37 = vld [vmem:[#allocation2 + $0x16] ss:$0 sm:$0xff] }
  0x1f   :  { %v78_v50 = vrot.slane %v77_v40, 4  ;;  %v128_v53 = vmul.f32 %v120_v43, %v120_v43  ;;  %v129_v55 = vmul.f32 %v125_v46, %v125_v46  ;;  %v130_v56 = vmul.f32 %v126_v47, %v126_v47 }
  0x20   :  { %v52_v54 = vmin.f32 %v50_v36, %v51_v45  ;;  %v147_v57 = vsub.f32 %v508_v44, %v612_v0  ;;  %v105_v59 = vmin.f32 %v103_v51, %v104_v52  ;;  %v148_v60 = vsub.f32 %v508_v44, %v614_v1 }
  0x21   :  { %v79_v58 = vmin.f32 %v77_v40, %v78_v50  ;;  %v153_v61 = vsub.f32 %v509_v49, %v616_v2  ;;  %v131_v63 = vadd.f32 %v129_v55, %v127_v48  ;;  %v132_v4 = vadd.f32 %v130_v56, %v128_v53  ;;  %v514_v50 = vld [vmem:[#allocation2 + $0x7] ss:$0 sm:$0xff] }
  0x22   :  { %v53_v62 = vrot.slane %v52_v54, 2  ;;  %v154_v5 = vsub.f32 %v509_v49, %v618_v3  ;;  %v106_v8 = vrot.slane %v105_v59, 4  ;;  %v155_v9 = vmul.f32 %v147_v57, %v147_v57 }
  0x23   :  { %v80_v7 = vrot.slane %v79_v58, 2  ;;  %v156_v10 = vmul.f32 %v148_v60, %v148_v60  ;;  %v133_v12 = vmin.f32 %v131_v63, %v132_v4  ;;  %v157_v13 = vmul.f32 %v153_v61, %v153_v61 }
  0x24   :  { %v54_v11 = vmin.f32 %v52_v54, %v53_v62  ;;  %v158_v14 = vmul.f32 %v154_v5, %v154_v5  ;;  %v107_v17 = vmin.f32 %v105_v59, %v106_v8  ;;  %v175_v18 = vsub.f32 %v510_v6, %v612_v0  ;;  %v515_v59 = vld [vmem:[#allocation2 + $0x17] ss:$0 sm:$0xff]  ;;  %v516_v8 = vld [vmem:[#allocation2 + $0x8] ss:$0 sm:$0xff] }
  0x25   :  { %v81_v16 = vmin.f32 %v79_v58, %v80_v7  ;;  %v176_v19 = vsub.f32 %v510_v6, %v614_v1  ;;  %v134_v21 = vrot.slane %v133_v12, 4  ;;  %v159_v22 = vadd.f32 %v157_v13, %v155_v9  ;;  %v517_v13 = vld [vmem:[#allocation2 + $0x18] ss:$0 sm:$0xff] }
  0x26   :  { %v55_v20 = vrot.slane %v54_v11, 1  ;;  %v160_v23 = vadd.f32 %v158_v14, %v156_v10  ;;  %v108_v25 = vrot.slane %v107_v17, 2  ;;  %v181_v26 = vsub.f32 %v511_v15, %v616_v2 }
  0x27   :  { %v82_v24 = vrot.slane %v81_v16, 1  ;;  %v182_v27 = vsub.f32 %v511_v15, %v618_v3  ;;  %v135_v30 = vmin.f32 %v133_v12, %v134_v21  ;;  %v183_v32 = vmul.f32 %v175_v18, %v175_v18 }
  0x28   :  { %v56_v29 = vmin.f32 %v54_v11, %v55_v20  ;;  %v161_v31 = vmin.f32 %v159_v22, %v160_v23  ;;  %v109_v34 = vmin.f32 %v107_v17, %v108_v25  ;;  %v184_v35 = vmul.f32 %v176_v19, %v176_v19 }
  0x29   :  { %v83_v33 = vmin.f32 %v81_v16, %v82_v24  ;;  %v185_v36 = vmul.f32 %v181_v26, %v181_v26  ;;  %v136_v38 = vrot.slane %v135_v30, 2  ;;  %v186_v40 = vmul.f32 %v182_v27, %v182_v27 }
  0x2a   :  { %v162_v39 = vrot.slane %v161_v31, 4  ;;  %v203_v41 = vsub.f32 %v512_v28, %v612_v0  ;;  %v110_v43 = vrot.slane %v109_v34, 1  ;;  %v204_v45 = vsub.f32 %v512_v28, %v614_v1 }
  0x2b   :  { %v84_v42 = vmin.f32 %v56_v29, %v83_v33  ;;  %v187_v44 = vadd.f32 %v185_v36, %v183_v32  ;;  %v137_v46 = vmin.f32 %v135_v30, %v136_v38  ;;  %v188_v48 = vadd.f32 %v186_v40, %v184_v35  ;;  %v518_v30 = vld [vmem:[#allocation2 + $0x9] ss:$0 sm:$0xff] }
  0x2c   :  { %v163_v47 = vmin.f32 %v161_v31, %v162_v39  ;;  %v209_v49 = vsub.f32 %v513_v37, %v616_v2  ;;  %v111_v51 = vmin.f32 %v109_v34, %v110_v43  ;;  %v210_v52 = vsub.f32 %v513_v37, %v618_v3  ;;  %v519_v31 = vld [vmem:[#allocation2 + $0x19] ss:$0 sm:$0xff] }
  0x2d   :  { %v211_v53 = vmul.f32 %v203_v41, %v203_v41  ;;  %v212_v54 = vmul.f32 %v204_v45, %v204_v45  ;;  %v138_v55 = vrot.slane %v137_v46, 1  ;;  %v189_v57 = vmin.f32 %v187_v44, %v188_v48  ;;  %v520_v48 = vld [vmem:[#allocation2 + $0xa] ss:$0 sm:$0xff] }
  0x2e   :  { %v164_v56 = vrot.slane %v163_v47, 2  ;;  %v213_v58 = vmul.f32 %v209_v49, %v209_v49  ;;  %v112_v60 = vmin.f32 %v84_v42, %v111_v51  ;;  %v214_v61 = vmul.f32 %v210_v52, %v210_v52 }
  0x2f   :  { %v231_v62 = vsub.f32 %v514_v50, %v612_v0  ;;  %v232_v63 = vsub.f32 %v514_v50, %v614_v1  ;;  %v139_v4 = vmin.f32 %v137_v46, %v138_v55  ;;  %v190_v6 = vrot.slane %v189_v57, 4 }
  0x30   :  { %v165_v5 = vmin.f32 %v163_v47, %v164_v56  ;;  %v215_v7 = vadd.f32 %v213_v58, %v211_v53  ;;  %v216_v9 = vadd.f32 %v214_v61, %v212_v54  ;;  %v237_v10 = vsub.f32 %v515_v59, %v616_v2 }
  0x31   :  { %v238_v11 = vsub.f32 %v515_v59, %v618_v3  ;;  %v239_v12 = vmul.f32 %v231_v62, %v231_v62  ;;  %v140_v14 = vmin.f32 %v112_v60, %v139_v4  ;;  %v191_v16 = vmin.f32 %v189_v57, %v190_v6  ;;  %v521_v57 = vld [vmem:[#allocation2 + $0x1a] ss:$0 sm:$0xff]  ;;  %v522_v6 = vld [vmem:[#allocation2 + $0xb] ss:$0 sm:$0xff] }
  0x32   :  { %v166_v15 = vrot.slane %v165_v5, 1  ;;  %v240_v17 = vmul.f32 %v232_v63, %v232_v63  ;;  %v217_v18 = vmin.f32 %v215_v7, %v216_v9  ;;  %v241_v19 = vmul.f32 %v237_v10, %v237_v10 }
  0x33   :  { %v242_v20 = vmul.f32 %v238_v11, %v238_v11  ;;  %v259_v21 = vsub.f32 %v516_v8, %v612_v0  ;;  %v192_v23 = vrot.slane %v191_v16, 2  ;;  %v260_v24 = vsub.f32 %v516_v8, %v614_v1 }
  0x34   :  { %v167_v22 = vmin.f32 %v165_v5, %v166_v15  ;;  %v265_v25 = vsub.f32 %v517_v13, %v616_v2  ;;  %v218_v26 = vrot.slane %v217_v18, 4  ;;  %v243_v27 = vadd.f32 %v241_v19, %v239_v12  ;;  %v523_v15 = vld [vmem:[#allocation2 + $0x1b] ss:$0 sm:$0xff] }
  0x35   :  { %v244_v28 = vadd.f32 %v242_v20, %v240_v17  ;;  %v266_v29 = vsub.f32 %v517_v13, %v618_v3  ;;  %v193_v33 = vmin.f32 %v191_v16, %v192_v23  ;;  %v267_v34 = vmul.f32 %v259_v21, %v259_v21 }
  0x36   :  { %v168_v32 = vmin.f32 %v140_v14, %v167_v22  ;;  %v268_v35 = vmul.f32 %v260_v24, %v260_v24  ;;  %v219_v36 = vmin.f32 %v217_v18, %v218_v26  ;;  %v269_v38 = vmul.f32 %v265_v25, %v265_v25 }
  0x37   :  { %v245_v37 = vmin.f32 %v243_v27, %v244_v28  ;;  %v270_v39 = vmul.f32 %v266_v29, %v266_v29  ;;  %v194_v40 = vrot.slane %v193_v33, 1  ;;  %v287_v41 = vsub.f32 %v518_v30, %v612_v0  ;;  %v524_v28 = vld [vmem:[#allocation2 + $0xc] ss:$0 sm:$0xff] }
  0x38   :  { %v288_v42 = vsub.f32 %v518_v30, %v614_v1  ;;  %v293_v43 = vsub.f32 %v519_v31, %v616_v2  ;;  %v220_v44 = vrot.slane %v219_v36, 2  ;;  %v271_v46 = vadd.f32 %v269_v38, %v267_v34 }
  0x39   :  { %v246_v45 = vrot.slane %v245_v37, 4  ;;  %v272_v47 = vadd.f32 %v270_v39, %v268_v35  ;;  %v195_v49 = vmin.f32 %v193_v33, %v194_v40  ;;  %v294_v50 = vsub.f32 %v519_v31, %v618_v3 }
  0x3a   :  { %v295_v51 = vmul.f32 %v287_v41, %v287_v41  ;;  %v296_v52 = vmul.f32 %v288_v42, %v288_v42  ;;  %v221_v53 = vmin.f32 %v219_v36, %v220_v44  ;;  %v297_v56 = vmul.f32 %v293_v43, %v293_v43 }
  0x3b   :  { %v247_v54 = vmin.f32 %v245_v37, %v246_v45  ;;  %v273_v55 = vmin.f32 %v271_v46, %v272_v47  ;;  %v196_v58 = vmin.f32 %v168_v32, %v195_v49  ;;  %v298_v59 = vmul.f32 %v294_v50, %v294_v50  ;;  %v525_v37 = vld [vmem:[#allocation2 + $0x1c] ss:$0 sm:$0xff]  ;;  %v526_v50 = vld [vmem:[#allocation2 + $0xd] ss:$0 sm:$0xff] }
  0x3c   :  { %v315_v60 = vsub.f32 %v520_v48, %v612_v0  ;;  %v316_v61 = vsub.f32 %v520_v48, %v614_v1  ;;  %v222_v62 = vrot.slane %v221_v53, 1  ;;  %v299_v5 = vadd.f32 %v297_v56, %v295_v51 }
  0x3d   :  { %v248_v63 = vrot.slane %v247_v54, 2  ;;  %v274_v4 = vrot.slane %v273_v55, 4  ;;  %v300_v7 = vadd.f32 %v298_v59, %v296_v52  ;;  %v321_v8 = vsub.f32 %v521_v57, %v616_v2 }
  0x3e   :  { %v322_v9 = vsub.f32 %v521_v57, %v618_v3  ;;  %v323_v10 = vmul.f32 %v315_v60, %v315_v60  ;;  %v223_v11 = vmin.f32 %v221_v53, %v222_v62  ;;  %v324_v14 = vmul.f32 %v316_v61, %v316_v61 }
  0x3f   :  { %v249_v12 = vmin.f32 %v247_v54, %v248_v63  ;;  %v275_v13 = vmin.f32 %v273_v55, %v274_v4  ;;  %v301_v16 = vmin.f32 %v299_v5, %v300_v7  ;;  %v325_v17 = vmul.f32 %v321_v8, %v321_v8  ;;  %v527_v55 = vld [vmem:[#allocation2 + $0x1d] ss:$0 sm:$0xff]  ;;  %v528_v8 = vld [vmem:[#allocation2 + $0xe] ss:$0 sm:$0xff] }
  0x40   :  { %v326_v18 = vmul.f32 %v322_v9, %v322_v9  ;;  %v343_v19 = vsub.f32 %v522_v6, %v612_v0  ;;  %v224_v20 = vmin.f32 %v196_v58, %v223_v11  ;;  %v344_v23 = vsub.f32 %v522_v6, %v614_v1 }
  0x41   :  { %v250_v21 = vrot.slane %v249_v12, 1  ;;  %v276_v22 = vrot.slane %v275_v13, 2  ;;  %v302_v24 = vrot.slane %v301_v16, 4  ;;  %v327_v25 = vadd.f32 %v325_v17, %v323_v10  ;;  %v529_v17 = vld [vmem:[#allocation2 + $0x1e] ss:$0 sm:$0xff] }
  0x42   :  { %v328_v26 = vadd.f32 %v326_v18, %v324_v14  ;;  %v349_v27 = vsub.f32 %v523_v15, %v616_v2  ;;  %v350_v31 = vsub.f32 %v523_v15, %v618_v3  ;;  %v351_v32 = vmul.f32 %v343_v19, %v343_v19 }
  0x43   :  { %v251_v29 = vmin.f32 %v249_v12, %v250_v21  ;;  %v277_v30 = vmin.f32 %v275_v13, %v276_v22  ;;  %v303_v33 = vmin.f32 %v301_v16, %v302_v24  ;;  %v352_v35 = vmul.f32 %v344_v23, %v344_v23 }
  0x44   :  { %v329_v34 = vmin.f32 %v327_v25, %v328_v26  ;;  %v353_v36 = vmul.f32 %v349_v27, %v349_v27  ;;  %v354_v40 = vmul.f32 %v350_v31, %v350_v31  ;;  %v371_v41 = vsub.f32 %v524_v28, %v612_v0 }
  0x45   :  { %v252_v38 = vmin.f32 %v224_v20, %v251_v29  ;;  %v278_v39 = vrot.slane %v277_v30, 1  ;;  %v304_v42 = vrot.slane %v303_v33, 2  ;;  %v372_v45 = vsub.f32 %v524_v28, %v614_v1 }
  0x46   :  { %v330_v43 = vrot.slane %v329_v34, 4  ;;  %v355_v44 = vadd.f32 %v353_v36, %v351_v32  ;;  %v356_v47 = vadd.f32 %v354_v40, %v352_v35  ;;  %v377_v48 = vsub.f32 %v525_v37, %v616_v2  ;;  %v531_v35 = vld [vmem:[#allocation2 + $0x1f] ss:$0 sm:$0xff] }
  0x47   :  { %v279_v46 = vmin.f32 %v277_v30, %v278_v39  ;;  %v378_v49 = vsub.f32 %v525_v37, %v618_v3  ;;  %v305_v51 = vmin.f32 %v303_v33, %v304_v42  ;;  %v379_v53 = vmul.f32 %v371_v41, %v371_v41  ;;  %v530_v30 = vld [vmem:[#allocation2 + $0xf] ss:$0 sm:$0xff] }
  0x48   :  { %v331_v52 = vmin.f32 %v329_v34, %v330_v43  ;;  %v380_v54 = vmul.f32 %v372_v45, %v372_v45  ;;  %v357_v57 = vmin.f32 %v355_v44, %v356_v47  ;;  %v381_v58 = vmul.f32 %v377_v48, %v377_v48 }
  0x49   :  { %v280_v56 = vmin.f32 %v252_v38, %v279_v46  ;;  %v382_v59 = vmul.f32 %v378_v49, %v378_v49  ;;  %v306_v60 = vrot.slane %v305_v51, 1  ;;  %v399_v62 = vsub.f32 %v526_v50, %v612_v0 }
  0x4a   :  { %v332_v61 = vrot.slane %v331_v52, 2  ;;  %v400_v63 = vsub.f32 %v526_v50, %v614_v1  ;;  %v358_v4 = vrot.slane %v357_v57, 4  ;;  %v383_v5 = vadd.f32 %v381_v58, %v379_v53 }
  0x4b   :  { %v384_v6 = vadd.f32 %v382_v59, %v380_v54  ;;  %v405_v7 = vsub.f32 %v527_v55, %v616_v2  ;;  %v307_v9 = vmin.f32 %v305_v51, %v306_v60  ;;  %v406_v11 = vsub.f32 %v527_v55, %v618_v3 }
  0x4c   :  { %v333_v10 = vmin.f32 %v331_v52, %v332_v61  ;;  %v407_v12 = vmul.f32 %v399_v62, %v399_v62  ;;  %v359_v13 = vmin.f32 %v357_v57, %v358_v4  ;;  %v408_v15 = vmul.f32 %v400_v63, %v400_v63 }
  0x4d   :  { %v385_v14 = vmin.f32 %v383_v5, %v384_v6  ;;  %v409_v16 = vmul.f32 %v405_v7, %v405_v7  ;;  %v308_v18 = vmin.f32 %v280_v56, %v307_v9  ;;  %v410_v20 = vmul.f32 %v406_v11, %v406_v11 }
  0x4e   :  { %v334_v19 = vrot.slane %v333_v10, 1  ;;  %v427_v21 = vsub.f32 %v528_v8, %v612_v0  ;;  %v360_v22 = vrot.slane %v359_v13, 2  ;;  %v428_v25 = vsub.f32 %v528_v8, %v614_v1 }
  0x4f   :  { %v386_v23 = vrot.slane %v385_v14, 4  ;;  %v411_v24 = vadd.f32 %v409_v16, %v407_v12  ;;  %v412_v27 = vadd.f32 %v410_v20, %v408_v15  ;;  %v433_v28 = vsub.f32 %v529_v17, %v616_v2 }
  0x50   :  { %v335_v26 = vmin.f32 %v333_v10, %v334_v19  ;;  %v434_v29 = vsub.f32 %v529_v17, %v618_v3  ;;  %v361_v31 = vmin.f32 %v359_v13, %v360_v22  ;;  %v435_v33 = vmul.f32 %v427_v21, %v427_v21 }
  0x51   :  { %v387_v32 = vmin.f32 %v385_v14, %v386_v23  ;;  %v436_v34 = vmul.f32 %v428_v25, %v428_v25  ;;  %v413_v37 = vmin.f32 %v411_v24, %v412_v27  ;;  %v437_v38 = vmul.f32 %v433_v28, %v433_v28 }
  0x52   :  { %v336_v36 = vmin.f32 %v308_v18, %v335_v26  ;;  %v438_v39 = vmul.f32 %v434_v29, %v434_v29  ;;  %v362_v40 = vrot.slane %v361_v31, 1  ;;  %v455_v42 = vsub.f32 %v530_v30, %v612_v0 }
  0x53   :  { %v388_v41 = vrot.slane %v387_v32, 2  ;;  %v456_v43 = vsub.f32 %v530_v30, %v614_v1  ;;  %v414_v44 = vrot.slane %v413_v37, 4  ;;  %v439_v45 = vadd.f32 %v437_v38, %v435_v33 }
  0x54   :  { %v440_v46 = vadd.f32 %v438_v39, %v436_v34  ;;  %v461_v47 = vsub.f32 %v531_v35, %v616_v2  ;;  %v363_v48 = vmin.f32 %v361_v31, %v362_v40  ;;  %v462_v50 = vsub.f32 %v531_v35, %v618_v3 }
  0x55   :  { %v389_v49 = vmin.f32 %v387_v32, %v388_v41  ;;  %v463_v51 = vmul.f32 %v455_v42, %v455_v42  ;;  %v415_v52 = vmin.f32 %v413_v37, %v414_v44  ;;  %v464_v54 = vmul.f32 %v456_v43, %v456_v43 }
  0x56   :  { %v441_v53 = vmin.f32 %v439_v45, %v440_v46  ;;  %v465_v55 = vmul.f32 %v461_v47, %v461_v47  ;;  %v466_v57 = vmul.f32 %v462_v50, %v462_v50  ;;  %v364_v1 = vmin.f32 %v336_v36, %v363_v48 }
  0x57   :  { %v390_v56 = vrot.slane %v389_v49, 1  ;;  %v416_v58 = vrot.slane %v415_v52, 2 }
  0x58   :  { %v442_v0 = vrot.slane %v441_v53, 4  ;;  %v467_v59 = vadd.f32 %v465_v55, %v463_v51  ;;  %v468_v61 = vadd.f32 %v466_v57, %v464_v54 }
  0x59   :  { %v391_v60 = vmin.f32 %v389_v49, %v390_v56  ;;  %v417_v62 = vmin.f32 %v415_v52, %v416_v58 }
  0x5a   :  { %v443_v63 = vmin.f32 %v441_v53, %v442_v0  ;;  %v469_v2 = vmin.f32 %v467_v59, %v468_v61 }
  0x5b   :  { %v418_v4 = vrot.slane %v417_v62, 1  ;;  %v392_v6 = vmin.f32 %v364_v1, %v391_v60 }
  0x5c   :  { %v444_v5 = vrot.slane %v443_v63, 2  ;;  %v470_v3 = vrot.slane %v469_v2, 4 }
  0x5d   :  { %v419_v7 = vmin.f32 %v417_v62, %v418_v4 }
  0x5e   :  { %v445_v8 = vmin.f32 %v443_v63, %v444_v5  ;;  %v471_v9 = vmin.f32 %v469_v2, %v470_v3 }
  0x5f   :  { %v420_v11 = vmin.f32 %v392_v6, %v419_v7 }
  0x60   :  { %v446_v10 = vrot.slane %v445_v8, 1  ;;  %v472_v12 = vrot.slane %v471_v9, 2 }
  0x62   :  { %v447_v13 = vmin.f32 %v445_v8, %v446_v10  ;;  %v473_v14 = vmin.f32 %v471_v9, %v472_v12 }
  0x64   :  { %v448_v15 = vmin.f32 %v420_v11, %v447_v13  ;;  %v474_v16 = vrot.slane %v473_v14, 1 }
  0x66   :  { %v475_v17 = vmin.f32 %v473_v14, %v474_v16 }
  0x68   :  { %v476_v18 = vmin.f32 %v448_v15, %v475_v17 }
  0x6a   :  { %536 = vrsqrt.f32 %v476_v18  ;;  %vm479_vm0 = vcmp.eq.f32.partialorder %v476_v18, inf  ;;  %v482_v20 = vand.u32 2147483648, %v476_v18  ;;  %vm481_vm1 = vcmp.eq.f32.partialorder %v476_v18, 0.0 }
  0x74   :  { %v537_v19 = vpop.eup %536 }
  0x75   :  { %v478_v21 = vmul.f32 %v537_v19, %v476_v18 }
  0x77   :  { %v480_v22 = vsel %vm479_vm0, %v476_v18, %v478_v21 }
  0x78   :  { %v483_v23 = vsel %vm481_vm1, %v482_v20, %v480_v22 }
  0x79   :  { %484 = vst [vmem:[#allocation5] sm:$0x1] %v483_v23 }
  0x7a   :  { %571 = shalt.err (!%p568_p12)
}
  0x7b   :  { %s572_s25 = scalar_lea.hbm %s697_s1, 16 }
  0x7c   :  { %p573_p13 = scmp.ne.s32.totalorder %s697_s1, %s572_s25  ;;  %p576_p0 = scmp.lt.u32.totalorder %s572_s25, %s697_s1 }
  0x7e   :  { %p578_p1 = pnand %p576_p0, %p573_p13 }
  0x80   :  { %581 = shalt.err (!%p578_p1)
}
  0x81   :  { %494 = dma.vmem_to_hbm [thread:$0]  %s492_s20, 16, %s697_s1, [#allocation4]  }
  0x82   :  { %584 = dma.done.wait [#allocation4], 16  }
  0x83   :  { %585 = vsyncadd [#allocation4], 4294967280 }
  0x84   :  { %498 = vsyncpa [#allocation3], 1 }
  0x85   :  { %499 = vsyncpa [#allocation4], 1 }

</bundles_post_ra>
